<compile_context>
chip_gen: v5e
topology: v5e:2x2
jax: 0.10.0
libtpu: 0.0.40
codegen_flags: <defaults>
</compile_context>

<pallas_src>
import functools

import jax
import jax.numpy as jnp
from jax.experimental import pallas as pl
from jax.experimental.pallas import tpu as pltpu

_LANE = 128


def _linear_block_kernel(x_ref, w_ref, p_ref, o_ref, *, activation,
                         negative_slope, use_norm, eps, mxu_dtype):
    x = x_ref[...]
    w = w_ref[...]
    if mxu_dtype is not None:
        x = x.astype(mxu_dtype)
        w = w.astype(mxu_dtype)

    # Linear: y = x @ W  (MXU), f32 accumulation.
    y = jnp.dot(x, w, preferred_element_type=jnp.float32)

    params = p_ref[...]            # (8, tn): row0=bias, row1=gamma, row2=beta

    if use_norm:
        # Batch-stat BN exactly cancels a per-feature bias -> skip the bias add.
        # One-pass stats: mean = E[y], var = E[y^2] - mean^2 (biased variance),
        # folded affine: y*scale + shift.
        mean = jnp.mean(y, axis=0, keepdims=True)
        mean_sq = jnp.mean(y * y, axis=0, keepdims=True)
        var = jnp.maximum(mean_sq - mean * mean, 0.0)   # guard f32 cancellation
        scale = params[1:2, :] * jax.lax.rsqrt(var + eps)
        shift = params[2:3, :] - mean * scale
        y = y * scale + shift
    else:
        y = y + params[0:1, :]                           # bias broadcasts over batch

    if activation == "relu":
        y = jnp.maximum(y, 0.0)
    elif activation == "tanh":
        y = jnp.tanh(y)
    elif activation == "leaky_relu":
        y = jnp.where(y >= 0.0, y, negative_slope * y)
    # "none" / None -> identity

    o_ref[...] = y.astype(o_ref.dtype)


def _vmem_capacity_bytes():
    """Physical VMEM per TensorCore (128 MiB v5e/v6e, 64 MiB v7x)."""
    try:
        cap = int(pltpu.get_tpu_info().vmem_capacity_bytes)
        if cap > 0:
            return cap
    except Exception:
        pass
    return 64 << 20  # conservative fallback (v7x per-TC)


def pack_linear_block_params(w, b=None, gamma=None, beta=None, *,
                             norm="batchnorm", mxu_dtype=None):
    """Init-time packing (call once, reuse across forward passes).

    w:     (in_features, out_features)   (transpose of PyTorch Linear.weight)
    b:     (out_features,) or None
    gamma: (out_features,) or None       (used only when norm == "batchnorm")
    beta:  (out_features,) or None
    Returns (w_packed, params) where w_packed is (Fin, f_pad) in the MXU
    storage dtype and params is (8, f_pad) f32 (row0=bias, row1=gamma, row2=beta).
    """
    Fin, Fout = w.shape
    use_norm = (norm == "batchnorm")
    f_pad = ((Fout + _LANE - 1) // _LANE) * _LANE
    storage_dtype = jnp.dtype(mxu_dtype) if mxu_dtype is not None else jnp.dtype(w.dtype)

    if f_pad == Fout:
        w_packed = jnp.asarray(w, storage_dtype)              # no copy if already right
    else:
        w_packed = jnp.zeros((Fin, f_pad), storage_dtype).at[:, :Fout].set(
            w.astype(storage_dtype))

    # Padded feature lanes are safe only because params is zero-initialized:
    # gamma=0 -> scale=0 -> padded outputs are exactly 0.
    params = jnp.zeros((8, f_pad), jnp.float32)
    if use_norm:
        g = jnp.ones((Fout,), jnp.float32) if gamma is None else jnp.asarray(gamma, jnp.float32).reshape(-1)
        bt = jnp.zeros((Fout,), jnp.float32) if beta is None else jnp.asarray(beta, jnp.float32).reshape(-1)
        params = params.at[1, :Fout].set(g)
        params = params.at[2, :Fout].set(bt)
    elif b is not None:
        params = params.at[0, :Fout].set(jnp.asarray(b, jnp.float32).reshape(-1))
    return w_packed, params


def linear_block_apply(x, w_packed, params, *, out_features=None,
                       activation="leaky_relu", negative_slope=0.01,
                       norm="batchnorm", eps=1e-5, mxu_dtype=None):
    """Hot path: fused Linear + (optional) BatchNorm1d + activation."""
    N, Fin = x.shape
    f_pad = w_packed.shape[1]
    Fout = f_pad if out_features is None else int(out_features)
    use_norm = (norm == "batchnorm")
    out_dtype = x.dtype

    x_isz = jnp.dtype(x.dtype).itemsize
    w_isz = jnp.dtype(w_packed.dtype).itemsize
    o_isz = jnp.dtype(out_dtype).itemsize

    # VMEM budget from the actual chip generation.
    cap = _vmem_capacity_bytes()
    budget = min(int(cap * 0.70), cap - (8 << 20))

    def _need(cand):
        # x is double-buffered by the pipeline even though its index_map is
        # constant; W/params/out tiles are double-buffered per grid step.
        return (2 * N * Fin * x_isz
                + 2 * (Fin * cand * w_isz + 8 * cand * 4 + N * cand * o_isz))

    tn = _LANE
    for cand in (1024, 512, 256, 128):
        if f_pad % cand:
            continue
        if f_pad >= 256 and f_pad // cand < 2:
            continue  # keep >=2 feature tiles so the parallel axis shards on v7x
        if _need(cand) <= budget:
            tn = cand
            break
    grid_n = f_pad // tn
    need = _need(tn)
    vmem_limit = int(min(cap - (8 << 20), max(2 * need + (4 << 20), 32 << 20)))

    kernel = functools.partial(
        _linear_block_kernel,
        activation=activation,
        negative_slope=float(negative_slope),
        use_norm=use_norm,
        eps=float(eps),
        mxu_dtype=None if mxu_dtype is None else jnp.dtype(mxu_dtype),
    )

    cost = pl.CostEstimate(
        flops=2 * N * Fin * f_pad + (10 if use_norm else 4) * N * f_pad,
        transcendentals=(N * f_pad if activation == "tanh" else 0)
        + (f_pad if use_norm else 0),
        bytes_accessed=(N * Fin * x_isz + Fin * f_pad * w_isz
                        + 8 * f_pad * 4 + N * f_pad * o_isz),
    )

    out_padded = pl.pallas_call(
        kernel,
        out_shape=jax.ShapeDtypeStruct((N, f_pad), out_dtype),
        grid=(grid_n,),
        in_specs=[
            pl.BlockSpec((N, Fin), lambda j: (0, 0)),     # x: resident across steps
            pl.BlockSpec((Fin, tn), lambda j: (0, j)),    # W feature-column tile
            pl.BlockSpec((8, tn), lambda j: (0, j)),      # packed bias/gamma/beta tile
        ],
        out_specs=pl.BlockSpec((N, tn), lambda j: (0, j)),
        compiler_params=pltpu.CompilerParams(
            dimension_semantics=("parallel",),            # megacore shard on v7x
            vmem_limit_bytes=vmem_limit,
        ),
        cost_estimate=cost,
    )(x, w_packed, params)

    if f_pad == Fout:
        return out_padded                                 # no extra HBM slice pass
    return out_padded[:, :Fout]


def linear_block(x, w, b=None, gamma=None, beta=None, *, activation="leaky_relu",
                 negative_slope=0.01, norm="batchnorm", eps=1e-5, mxu_dtype=None):
    """Convenience one-shot wrapper (packs params per call; prefer the split API)."""
    w_packed, params = pack_linear_block_params(w, b, gamma, beta, norm=norm,
                                                mxu_dtype=mxu_dtype)
    return linear_block_apply(x, w_packed, params, out_features=w.shape[1],
                              activation=activation, negative_slope=negative_slope,
                              norm=norm, eps=eps, mxu_dtype=mxu_dtype)


def _reference(x, w, b, gamma, beta, *, activation, negative_slope, norm, eps):
    y = x @ w
    if b is not None:
        y = y + jnp.asarray(b).reshape(1, -1)
    if norm == "batchnorm":
        mean = jnp.mean(y, axis=0, keepdims=True)
        var = jnp.mean((y - mean) ** 2, axis=0, keepdims=True)
        y = (y - mean) / jnp.sqrt(var + eps)
        y = y * jnp.asarray(gamma).reshape(1, -1) + jnp.asarray(beta).reshape(1, -1)
    if activation == "relu":
        y = jnp.maximum(y, 0.0)
    elif activation == "tanh":
        y = jnp.tanh(y)
    elif activation == "leaky_relu":
        y = jnp.where(y >= 0.0, y, negative_slope * y)
    return y


if __name__ == "__main__":
    # Module config under test: in_features=32, out_features=64, bias=True,
    # activation="leaky_relu", norm="batchnorm".
    N, Fin, Fout = 8, 32, 64
    negative_slope = 0.01

    key = jax.random.PRNGKey(0)
    kx, kw, kb, kg, kbeta = jax.random.split(key, 5)

    x = jax.random.normal(kx, (N, Fin), dtype=jnp.float32)

    bound_w = 1.0 / jnp.sqrt(Fin)
    w = jax.random.uniform(kw, (Fin, Fout), jnp.float32, -bound_w, bound_w)
    b = jax.random.uniform(kb, (Fout,), jnp.float32, -bound_w, bound_w)
    gamma = jnp.ones((Fout,), jnp.float32) + 0.1 * jax.random.normal(kg, (Fout,))
    beta = 0.1 * jax.random.normal(kbeta, (Fout,))

    # --- 1) leaky_relu + batchnorm, f32 MXU operands (strict tolerance) ------
    wp, pp = pack_linear_block_params(w, b, gamma, beta, norm="batchnorm")
    out = linear_block_apply(x, wp, pp, out_features=Fout,
                             activation="leaky_relu",
                             negative_slope=negative_slope, norm="batchnorm")
    out = jax.block_until_ready(out)
    ref = _reference(x, w, b, gamma, beta, activation="leaky_relu",
                     negative_slope=negative_slope, norm="batchnorm", eps=1e-5)
    assert out.shape == (N, Fout)
    assert jnp.allclose(out, ref, atol=1e-5, rtol=1e-5), "mismatch (bn+leaky_relu, f32)"

    # --- 2) relu, no norm (exercises the bias path), f32 ---------------------
    wp2, pp2 = pack_linear_block_params(w, b, norm=None)
    out2 = linear_block_apply(x, wp2, pp2, out_features=Fout,
                              activation="relu", norm=None)
    out2 = jax.block_until_ready(out2)
    ref2 = _reference(x, w, b, None, None, activation="relu",
                      negative_slope=0.0, norm=None, eps=1e-5)
    assert jnp.allclose(out2, ref2, atol=1e-5, rtol=1e-5), "mismatch (bias+relu, f32)"

    # --- 3) bf16 MXU operands (halved weight-stream bytes), looser tolerance -
    wp3, pp3 = pack_linear_block_params(w, b, gamma, beta, norm="batchnorm",
                                        mxu_dtype=jnp.bfloat16)
    out3 = linear_block_apply(x, wp3, pp3, out_features=Fout,
                              activation="leaky_relu",
                              negative_slope=negative_slope, norm="batchnorm",
                              mxu_dtype=jnp.bfloat16)
    out3 = jax.block_until_ready(out3)
    assert jnp.allclose(out3, ref, atol=5e-2, rtol=5e-2), "mismatch (bn+leaky_relu, bf16)"

    print("KERNEL_OK")
</pallas_src>

<mosaic_0001>
module attributes {stable_mosaic.version = 11 : i64} {
  func.func @_linear_block_kernel(%arg0: i32, %arg1: memref<8x32xf32, #tpu.memory_space<vmem>>, %arg2: memref<32x128xf32, #tpu.memory_space<vmem>>, %arg3: memref<8x128xf32, #tpu.memory_space<vmem>>, %arg4: memref<8x128xf32, #tpu.memory_space<vmem>>) attributes {dimension_semantics = [#tpu.dimension_semantics<parallel>], iteration_bounds = array<i64: 1>, scalar_prefetch = 0 : i64, scratch_operands = 0 : i64, tpu.core_type = #tpu.core_type<tc>, window_params = [{pipeline_mode = #tpu.pipeline_mode<synchronous>, transform_indices = @transform_0, window_bounds = array<i64: 8, 32>}, {transform_indices = @transform_1, window_bounds = array<i64: 32, 128>}, {transform_indices = @transform_2, window_bounds = array<i64: 8, 128>}, {transform_indices = @transform_3, window_bounds = array<i64: 8, 128>}]} {
    %c0 = arith.constant 0 : index
    %c0_0 = arith.constant 0 : index
    %0 = vector.load %arg1[%c0, %c0_0] : memref<8x32xf32, #tpu.memory_space<vmem>>, vector<8x32xf32>
    %c0_1 = arith.constant 0 : index
    %c0_2 = arith.constant 0 : index
    %1 = vector.load %arg2[%c0_1, %c0_2] : memref<32x128xf32, #tpu.memory_space<vmem>>, vector<32x128xf32>
    %cst = arith.constant dense<0.000000e+00> : vector<8x128xf32>
    %2 = tpu.matmul %0, %1, %cst {dimension_numbers = #tpu.dot_dimension_numbers<[1], [0], [0], [1], [0, 0, 1, 1], [], []>} : vector<8x32xf32>, vector<32x128xf32>, vector<8x128xf32> -> vector<8x128xf32>
    %c0_3 = arith.constant 0 : index
    %c0_4 = arith.constant 0 : index
    %3 = vector.load %arg3[%c0_3, %c0_4] : memref<8x128xf32, #tpu.memory_space<vmem>>, vector<8x128xf32>
    %cst_5 = arith.constant dense<0.000000e+00> : vector<128xf32>
    %4 = vector.multi_reduction <add>, %2, %cst_5 [0] : vector<8x128xf32> to vector<128xf32>
    %5 = vector.shape_cast %4 : vector<128xf32> to vector<1x128xf32>
    %cst_6 = arith.constant 8.000000e+00 : f32
    %6 = vector.broadcast %cst_6 : f32 to vector<1x128xf32>
    %7 = arith.divf %5, %6 : vector<1x128xf32>
    %8 = arith.mulf %2, %2 : vector<8x128xf32>
    %cst_7 = arith.constant dense<0.000000e+00> : vector<128xf32>
    %9 = vector.multi_reduction <add>, %8, %cst_7 [0] : vector<8x128xf32> to vector<128xf32>
    %10 = vector.shape_cast %9 : vector<128xf32> to vector<1x128xf32>
    %cst_8 = arith.constant 8.000000e+00 : f32
    %11 = vector.broadcast %cst_8 : f32 to vector<1x128xf32>
    %12 = arith.divf %10, %11 : vector<1x128xf32>
    %13 = arith.mulf %7, %7 : vector<1x128xf32>
    %14 = arith.subf %12, %13 : vector<1x128xf32>
    %cst_9 = arith.constant 0.000000e+00 : f32
    %15 = vector.broadcast %cst_9 : f32 to vector<1x128xf32>
    %16 = arith.maximumf %14, %15 : vector<1x128xf32>
    %17 = vector.extract_strided_slice %3 {offsets = [1, 0], sizes = [1, 128], strides = [1, 1]} : vector<8x128xf32> to vector<1x128xf32>
    %cst_10 = arith.constant 9.99999974E-6 : f32
    %18 = vector.broadcast %cst_10 : f32 to vector<1x128xf32>
    %19 = arith.addf %16, %18 : vector<1x128xf32>
    %20 = math.rsqrt %19 : vector<1x128xf32>
    %21 = arith.mulf %17, %20 : vector<1x128xf32>
    %22 = vector.extract_strided_slice %3 {offsets = [2, 0], sizes = [1, 128], strides = [1, 1]} : vector<8x128xf32> to vector<1x128xf32>
    %23 = arith.mulf %7, %21 : vector<1x128xf32>
    %24 = arith.subf %22, %23 : vector<1x128xf32>
    %25 = vector.broadcast %21 : vector<1x128xf32> to vector<8x128xf32>
    %26 = arith.mulf %2, %25 : vector<8x128xf32>
    %27 = vector.broadcast %24 : vector<1x128xf32> to vector<8x128xf32>
    %28 = arith.addf %26, %27 : vector<8x128xf32>
    %cst_11 = arith.constant 0.000000e+00 : f32
    %29 = vector.broadcast %cst_11 : f32 to vector<8x128xf32>
    %30 = arith.cmpf oge, %28, %29 : vector<8x128xf32>
    %cst_12 = arith.constant 0.00999999977 : f32
    %31 = vector.broadcast %cst_12 : f32 to vector<8x128xf32>
    %32 = arith.mulf %31, %28 : vector<8x128xf32>
    %33 = arith.select %30, %28, %32 : vector<8x128xi1>, vector<8x128xf32>
    %c0_13 = arith.constant 0 : index
    %c0_14 = arith.constant 0 : index
    %34 = vector.load %arg4[%c0_13, %c0_14] : memref<8x128xf32, #tpu.memory_space<vmem>>, vector<8x128xf32>
    tpu.vector_store %arg4[%c0_13, %c0_14], %33 {strides = array<i32>} : memref<8x128xf32, #tpu.memory_space<vmem>>, vector<8x128xf32>,
    return
  }
  func.func @transform_0(%arg0: i32) -> (i32, i32) {
    %c0_i32 = arith.constant 0 : i32
    %c0_i32_0 = arith.constant 0 : i32
    %c0_i32_1 = arith.constant 0 : i32
    return %c0_i32, %c0_i32_0 : i32, i32
  }
  func.func @transform_1(%arg0: i32) -> (i32, i32) {
    %c0_i32 = arith.constant 0 : i32
    %c0_i32_0 = arith.constant 0 : i32
    return %c0_i32, %arg0 : i32, i32
  }
  func.func @transform_2(%arg0: i32) -> (i32, i32) {
    %c0_i32 = arith.constant 0 : i32
    %c0_i32_0 = arith.constant 0 : i32
    return %c0_i32, %arg0 : i32, i32
  }
  func.func @transform_3(%arg0: i32) -> (i32, i32) {
    %c0_i32 = arith.constant 0 : i32
    %c0_i32_0 = arith.constant 0 : i32
    return %c0_i32, %arg0 : i32, i32
  }
}

</mosaic_0001>

<bundles_post_ra>
// kernel: tpu_custom_call.1
= control target key start
LH: loop header
LB: loop body
LE: loop exit
PB: predicated region body
PF: predicated region fallthrough
CT: control target
= control target key end

     0   :  { %8 = vsyncpa [#allocation3], 0  ;;  %s309_s0 = inlined_call_operand.hbm [shape: f32[8,32], index: 0, kind: input, shape index: {}]   ;;  %s310_s1 = inlined_call_operand.hbm [shape: f32[32,128], index: 1, kind: input, shape index: {}]   ;;  %s311_s2 = inlined_call_operand.hbm [shape: f32[8,128], index: 2, kind: input, shape index: {}]   ;;  %s312_s3 = inlined_call_operand.hbm [shape: f32[8,128], index: 3, kind: output, shape index: {}]  }
   0x1   :  { %9 = vsyncpa [#allocation6], 0  ;;  %s26_s14 = sshll.u32 %s310_s1, 4  ;;  %s27_s14 = int_to_ptr.hbm [resolvable:$true] %s26_s14 }
   0x2   :  { %10 = vsyncpa [#allocation4], 0  ;;  %s270_s15 = smov [#allocation5]   ;;  %s16_s19 = sshll.u32 %s309_s0, 4  ;;  %s17_s19 = int_to_ptr.hbm [resolvable:$true] %s16_s19 }
   0x3   :  { %s28_s16 = sshll.u32 %s270_s15, 4  ;;  %s271_s20 = smov 128   ;;  %s29_s16 = int_to_ptr.vmem [resolvable:$true] %s28_s16 }
   0x4   :  { %s272_s21 = smov 8   ;;  %s273_s22 = smov [#allocation2]  }
   0x5   :  { %34 = dma.hbm_to_vmem [thread:$0]  %s27_s14, 512, %s29_s16, [#allocation6], %s271_s20, %s271_s20, %s272_s21  }
   0x6   :  { %s18_s23 = sshll.u32 %s273_s22, 4  ;;  %s40_s26 = sshll.u32 %s311_s2, 4  ;;  %s19_s23 = int_to_ptr.vmem [resolvable:$true] %s18_s23  ;;  %s41_s26 = int_to_ptr.hbm [resolvable:$true] %s40_s26 }
   0x7   :  { %21 = dma.hbm_to_vmem [thread:$0]  %s17_s19, 128, %s19_s23, [#allocation3]  }
   0x8   :  { %s274_s1 = smov [#allocation7]  }
   0x9   :  { %s42_s27 = sshll.u32 %s274_s1, 4  ;;  %s43_s27 = int_to_ptr.vmem [resolvable:$true] %s42_s27 }
   0xa   :  { %45 = dma.hbm_to_vmem [thread:$0]  %s41_s26, 128, %s43_s27, [#allocation6]  }
   0xb   :  { %264 = dma.done.wait [#allocation3], 128  }
   0xc   :  { %265 = vsyncadd [#allocation3], 4294967168 }
   0xd   :  { %266 = dma.done.wait [#allocation6], 640  }
   0xe   :  { %267 = vsyncadd [#allocation6], 4294966656  ;;  %v62_v0 = vld [vmem:[#allocation5 + $0x18] sm:$0xff]  ;;  %v61_v1 = vld [vmem:[#allocation5 + $0x10] sm:$0xff]  ;;  %vm63_vm0 = vcmask 261120   ;;  %v275_v5 = vmov 8.0  }
   0xf   :  { %79 = vmatpush.msra.mxu0 %v62_v0  ;;  %v60_v2 = vld [vmem:[#allocation5 + $0x8] sm:$0xff]  ;;  %v59_v3 = vld [vmem:[#allocation5] sm:$0xff]  ;;  %v58_v4 = vld [vmem:[#allocation2] sm:$0xff]  ;;  %164 = vrcp.f32 %v275_v5  ;;  %s276_s0 = smov [#allocation8]   ;;  %s145_s30 = sshll.u32 %s312_s3, 4  ;;  %s146_s30 = int_to_ptr.hbm [resolvable:$true] %s145_s30 }
  0x10   :  { %v87_v37 = vld [vmem:[#allocation7] sm:$0xff]  ;;  %s143_s2 = sshll.u32 %s276_s0, 4  ;;  %s144_s2 = int_to_ptr.vmem [resolvable:$true] %s143_s2 }
  0x11   :  { %80 = vmatpush.msra.mxu0 %v61_v1 }
  0x13   :  { %81 = vmatpush.msra.mxu0 %v60_v2 }
  0x15   :  { %82 = vmatpush.msra.mxu0 %v59_v3  ;;  %v165_v6 = vpop.eup %164 }
  0x16   :  { %156 = vmatmul.msk.f32.vlgmr.msra.gmra.mxu0 %vm63_vm0, %v58_v4  ;;  %v95_v7 = vmul.f32 8.0, %v165_v6  ;;  %vm99_vm1 = vweird.f32 %v165_v6 }
  0x18   :  { %v96_v8 = vsub.f32 1.0, %v95_v7 }
  0x1a   :  { %v97_v12 = vmul.f32 %v165_v6, %v96_v8 }
  0x1c   :  { %v98_v17 = vadd.f32 %v165_v6, %v97_v12 }
  0x1e   :  { %v100_v22 = vsel %vm99_vm1, %v165_v6, %v98_v17 }
  0x93   :  { %v84_v9 = vpop.f32.mrf.mxu0 }
  0x94   :  { %v88_v10 = vrot.slane %v84_v9, 4  ;;  %v102_v11 = vmul.f32 %v84_v9, %v84_v9 }
  0x96   :  { %v89_v13 = vadd.f32 %v88_v10, %v84_v9  ;;  %v103_v14 = vrot.slane %v102_v11, 4 }
  0x98   :  { %v90_v15 = vrot.slane %v89_v13, 2  ;;  %v104_v16 = vadd.f32 %v103_v14, %v102_v11 }
  0x9a   :  { %v91_v18 = vadd.f32 %v90_v15, %v89_v13  ;;  %v105_v19 = vrot.slane %v104_v16, 2 }
  0x9c   :  { %v92_v20 = vrot.slane %v91_v18, 1  ;;  %v106_v21 = vadd.f32 %v105_v19, %v104_v16 }
  0x9e   :  { %v93_v23 = vadd.f32 %v92_v20, %v91_v18  ;;  %v107_v24 = vrot.slane %v106_v21, 1 }
  0xa0   :  { %v101_v25 = vmul.f32 %v100_v22, %v93_v23  ;;  %v108_v26 = vadd.f32 %v107_v24, %v106_v21 }
  0xa2   :  { %v109_v27 = vmul.f32 %v108_v26, %v100_v22  ;;  %v110_v28 = vmul.f32 %v101_v25, %v101_v25 }
  0xa4   :  { %v111_v29 = vsub.f32 %v109_v27, %v110_v28 }
  0xa6   :  { %v112_v30 = vmax.f32 %v111_v29, 0.0 }
  0xa8   :  { %v113_v31 = vadd.f32 1e-05, %v112_v30 }
  0xaa   :  { %166 = vrsqrt.f32 %v113_v31  ;;  %vm120_vm3 = vweird.f32 %v113_v31 }
  0xb0   :  { %v167_v32 = vpop.eup %166 }
  0xb1   :  { %v115_v33 = vmul.f32 %v167_v32, %v113_v31  ;;  %vm121_vm2 = vweird.f32 %v167_v32 }
  0xb2   :  { %vm122_vm4 = vmor %vm120_vm3, %vm121_vm2 }
  0xb3   :  { %v116_v34 = vmul.f32 %v167_v32, %v115_v33 }
  0xb5   :  { %v117_v35 = vmul.f32 0.5, %v116_v34 }
  0xb7   :  { %v118_v36 = vsub.f32 1.5, %v117_v35 }
  0xb9   :  { %v119_v38 = vmul.f32 %v167_v32, %v118_v36 }
  0xbb   :  { %v123_v39 = vsel %vm122_vm4, %v167_v32, %v119_v38 }
  0xbc   :  { %v124_v40 = vmul.f32 %v123_v39, %v87_v37 }
  0xbe   :  { %v125_v41 = vmul.f32 %v124_v40, %v101_v25  ;;  %v130_v43 = vperm.slane %v124_v40, 1 }
  0xc0   :  { %v127_v42 = vrot.slane %v125_v41, 7  ;;  %v131_v45 = vmul.f32 %v130_v43, %v84_v9 }
  0xc2   :  { %v129_v44 = vsub.f32 %v87_v37, %v127_v42 }
  0xc4   :  { %v132_v46 = vperm.slane %v129_v44, 2 }
  0xc6   :  { %v133_v47 = vadd.f32 %v132_v46, %v131_v45 }
  0xc8   :  { %vm134_vm5 = vcmp.ge.f32.partialorder %v133_v47, 0.0  ;;  %v135_v48 = vmul.f32 0.01, %v133_v47 }
  0xca   :  { %v136_v49 = vsel %vm134_vm5, %v133_v47, %v135_v48 }
  0xcb   :  { %137 = vst [vmem:[#allocation8] sm:$0xff] %v136_v49 }
  0xcc   :  { %148 = dma.vmem_to_hbm [thread:$0]  %s144_s2, 128, %s146_s30, [#allocation4]  }
  0xcd   :  { %268 = dma.done.wait [#allocation4], 128  }
  0xce   :  { %269 = vsyncadd [#allocation4], 4294967168 }
  0xcf   :  { %153 = vsyncpa [#allocation3], 1 }
  0xd0   :  { %154 = vsyncpa [#allocation6], 1 }
  0xd1   :  { %155 = vsyncpa [#allocation4], 1 }

</bundles_post_ra>
